<compile_context>
chip_gen: v7x
topology: tpu7x:2x2x1
jax: 0.10.0
libtpu: 0.0.40
codegen_flags: <defaults>
</compile_context>

<pallas_src>
import jax
import jax.numpy as jnp
from jax.experimental import pallas as pl
from jax.experimental.pallas import tpu as pltpu

LN_EPS = 1e-5          # PyTorch nn.LayerNorm default
MAX_BATCH_TILE = 256   # rows per grid step for large batches


def _layernorm(h, gamma, beta):
    mu = jnp.mean(h, axis=-1, keepdims=True)
    var = jnp.mean((h - mu) * (h - mu), axis=-1, keepdims=True)
    return (h - mu) * jax.lax.rsqrt(var + LN_EPS) * gamma + beta


def critic_kernel(s_ref, a_ref,            # activations (batch tile)
                  w1s_ref, w1a_ref, v1_ref,  # layer 1: split weights + packed (b1,g1,be1)
                  w2_ref, v2_ref,            # layer 2: weight + packed (b2,g2,be2)
                  head_ref,                  # packed (wq_row, bq)
                  out_ref):                  # (TB, 128) lane-dense slab
    w_dtype = w1s_ref.dtype

    # ---- fc1 (fused concat): h = state @ W1_s + action @ W1_a + b1 ----
    s = s_ref[...].astype(w_dtype)
    a = a_ref[...].astype(w_dtype)
    h = (jnp.dot(s, w1s_ref[...], preferred_element_type=jnp.float32)
         + jnp.dot(a, w1a_ref[...], preferred_element_type=jnp.float32))
    v1 = v1_ref[...].astype(jnp.float32)           # rows: b1, gamma1, beta1
    h = jnp.maximum(h + v1[0:1, :], 0.0)
    h = _layernorm(h, v1[1:2, :], v1[2:3, :])

    # ---- fc2 ----
    h = jnp.dot(h.astype(w_dtype), w2_ref[...], preferred_element_type=jnp.float32)
    v2 = v2_ref[...].astype(jnp.float32)           # rows: b2, gamma2, beta2
    h = jnp.maximum(h + v2[0:1, :], 0.0)
    h = _layernorm(h, v2[1:2, :], v2[2:3, :])

    # ---- q head: VPU multiply + lane reduce (no N=1 MXU matmul) ----
    head = head_ref[...].astype(jnp.float32)       # rows: wq_row, bq (broadcast)
    q = jnp.sum(h * head[0:1, :], axis=-1, keepdims=True) + head[1:2, 0:1]  # (TB, 1)

    # lane-dense store: broadcast q across 128 lanes -> unmasked vst
    out_ref[...] = jnp.broadcast_to(q, out_ref.shape).astype(out_ref.dtype)


@jax.jit
def critic_forward(state, action, params):
    B, d_s = state.shape
    d_a = action.shape[1]
    fc1, fc2 = params["w2"].shape

    TB = B if B <= MAX_BATCH_TILE else MAX_BATCH_TILE
    nb = pl.cdiv(B, TB)

    args = (state, action,
            params["w1s"], params["w1a"], params["v1"],
            params["w2"], params["v2"], params["head"])

    in_specs = [
        pl.BlockSpec((TB, d_s), lambda i: (i, 0)),        # state  (batch-tiled)
        pl.BlockSpec((TB, d_a), lambda i: (i, 0)),        # action (batch-tiled)
        pl.BlockSpec((d_s, fc1), lambda i: (0, 0)),       # W1_s   (resident)
        pl.BlockSpec((d_a, fc1), lambda i: (0, 0)),       # W1_a   (resident)
        pl.BlockSpec((3, fc1), lambda i: (0, 0)),         # b1/g1/be1
        pl.BlockSpec((fc1, fc2), lambda i: (0, 0)),       # W2     (resident)
        pl.BlockSpec((3, fc2), lambda i: (0, 0)),         # b2/g2/be2
        pl.BlockSpec((2, fc2), lambda i: (0, 0)),         # wq_row / bq
    ]
    out_spec = pl.BlockSpec((TB, 128), lambda i: (i, 0))

    flops = 2 * B * (d_s * fc1 + d_a * fc1 + fc1 * fc2 + fc2) + 10 * B * (fc1 + fc2)
    bytes_accessed = sum(int(a.size) * a.dtype.itemsize for a in args) + B * 128 * 4
    cost = pl.CostEstimate(flops=flops, transcendentals=2 * B,
                           bytes_accessed=bytes_accessed)

    out = pl.pallas_call(
        critic_kernel,
        out_shape=jax.ShapeDtypeStruct((B, 128), jnp.float32),
        grid_spec=pltpu.PrefetchScalarGridSpec(
            num_scalar_prefetch=0,
            grid=(nb,),
            in_specs=in_specs,
            out_specs=out_spec,
        ),
        compiler_params=pltpu.CompilerParams(
            dimension_semantics=("parallel",)),   # megacore sharding on v7x
        cost_estimate=cost,
    )(*args)

    return out[:, :1]   # (B, 1), matches the PyTorch module's output shape


def init_params(key, input_dims, n_actions, fc1_dims, fc2_dims,
                weights_dtype=jnp.float32):
    """Packed param layout. Matches PyTorch nn.Linear (uniform +/-1/sqrt(fan_in))
    and nn.LayerNorm (weight=1, bias=0) defaults. `weights_dtype=jnp.bfloat16`
    narrows the MXU operands on v6e/v7x; LN/head params stay f32 (VPU math)."""
    # NOTE: for realistic perf, pick fc1_dims/fc2_dims as multiples of 128 so
    # the lane axis is fully populated.
    d_in = input_dims + n_actions
    ks = jax.random.split(key, 6)

    def lin(kw, kb, fan_in, fan_out):
        bound = 1.0 / jnp.sqrt(jnp.float32(fan_in))
        w = jax.random.uniform(kw, (fan_in, fan_out), jnp.float32, -bound, bound)
        b = jax.random.uniform(kb, (fan_out,), jnp.float32, -bound, bound)
        return w, b

    w1, b1 = lin(ks[0], ks[1], d_in, fc1_dims)
    w2, b2 = lin(ks[2], ks[3], fc1_dims, fc2_dims)
    wq, bq = lin(ks[4], ks[5], fc2_dims, 1)          # wq: (fc2, 1), bq: (1,)

    return {
        "w1s": w1[:input_dims].astype(weights_dtype),
        "w1a": w1[input_dims:].astype(weights_dtype),
        "v1": jnp.stack([b1, jnp.ones((fc1_dims,), jnp.float32),
                         jnp.zeros((fc1_dims,), jnp.float32)], axis=0),
        "w2": w2.astype(weights_dtype),
        "v2": jnp.stack([b2, jnp.ones((fc2_dims,), jnp.float32),
                         jnp.zeros((fc2_dims,), jnp.float32)], axis=0),
        "head": jnp.concatenate(
            [wq.T, jnp.broadcast_to(bq, (1, fc2_dims))], axis=0).astype(jnp.float32),
    }


def critic_reference(state, action, params):
    """Pure-JAX reference of the same forward pass, for verification."""
    x = jnp.concatenate([state, action], axis=1)
    w1 = jnp.concatenate([params["w1s"], params["w1a"]], axis=0).astype(jnp.float32)
    v1, v2 = params["v1"], params["v2"]
    h = jnp.maximum(x @ w1 + v1[0:1, :], 0.0)
    h = _layernorm(h, v1[1:2, :], v1[2:3, :])
    h = jnp.maximum(h @ params["w2"].astype(jnp.float32) + v2[0:1, :], 0.0)
    h = _layernorm(h, v2[1:2, :], v2[2:3, :])
    head = params["head"]
    return jnp.sum(h * head[0:1, :], axis=-1, keepdims=True) + head[1:2, 0:1]


if __name__ == "__main__":
    # Small shapes consistent with the module's constructor:
    #   input_dims = [8], n_actions = 4, fc1_dims = 32, fc2_dims = 32, batch = 2
    B, INPUT_DIMS, N_ACTIONS, FC1, FC2 = 2, 8, 4, 32, 32

    key = jax.random.PRNGKey(0)
    k_state, k_action, k_params = jax.random.split(key, 3)

    state = jax.random.normal(k_state, (B, INPUT_DIMS), jnp.float32)
    action = jax.random.normal(k_action, (B, N_ACTIONS), jnp.float32)
    params = init_params(k_params, INPUT_DIMS, N_ACTIONS, FC1, FC2)

    q = critic_forward(state, action, params)
    q = jax.block_until_ready(q)

    q_ref = critic_reference(state, action, params)
    assert q.shape == (B, 1), q.shape
    assert jnp.allclose(q, q_ref, atol=1e-5, rtol=1e-5), (q, q_ref)

    print("KERNEL_OK")
</pallas_src>

<mosaic_0001>
module attributes {stable_mosaic.version = 11 : i64} {
  func.func @critic_kernel(%arg0: i32, %arg1: memref<2x8xf32, #tpu.memory_space<vmem>>, %arg2: memref<2x4xf32, #tpu.memory_space<vmem>>, %arg3: memref<8x32xf32, #tpu.memory_space<vmem>>, %arg4: memref<4x32xf32, #tpu.memory_space<vmem>>, %arg5: memref<3x32xf32, #tpu.memory_space<vmem>>, %arg6: memref<32x32xf32, #tpu.memory_space<vmem>>, %arg7: memref<3x32xf32, #tpu.memory_space<vmem>>, %arg8: memref<2x32xf32, #tpu.memory_space<vmem>>, %arg9: memref<2x128xf32, #tpu.memory_space<vmem>>) attributes {dimension_semantics = [#tpu.dimension_semantics<parallel>], iteration_bounds = array<i64: 1>, scalar_prefetch = 0 : i64, scratch_operands = 0 : i64, tpu.core_type = #tpu.core_type<tc>, window_params = [{transform_indices = @transform_0, window_bounds = array<i64: 2, 8>}, {transform_indices = @transform_1, window_bounds = array<i64: 2, 4>}, {pipeline_mode = #tpu.pipeline_mode<synchronous>, transform_indices = @transform_2, window_bounds = array<i64: 8, 32>}, {pipeline_mode = #tpu.pipeline_mode<synchronous>, transform_indices = @transform_3, window_bounds = array<i64: 4, 32>}, {pipeline_mode = #tpu.pipeline_mode<synchronous>, transform_indices = @transform_4, window_bounds = array<i64: 3, 32>}, {pipeline_mode = #tpu.pipeline_mode<synchronous>, transform_indices = @transform_5, window_bounds = array<i64: 32, 32>}, {pipeline_mode = #tpu.pipeline_mode<synchronous>, transform_indices = @transform_6, window_bounds = array<i64: 3, 32>}, {pipeline_mode = #tpu.pipeline_mode<synchronous>, transform_indices = @transform_7, window_bounds = array<i64: 2, 32>}, {transform_indices = @transform_8, window_bounds = array<i64: 2, 128>}]} {
    %c0 = arith.constant 0 : index
    %c0_0 = arith.constant 0 : index
    %0 = vector.load %arg1[%c0, %c0_0] : memref<2x8xf32, #tpu.memory_space<vmem>>, vector<2x8xf32>
    %c0_1 = arith.constant 0 : index
    %c0_2 = arith.constant 0 : index
    %1 = vector.load %arg2[%c0_1, %c0_2] : memref<2x4xf32, #tpu.memory_space<vmem>>, vector<2x4xf32>
    %c0_3 = arith.constant 0 : index
    %c0_4 = arith.constant 0 : index
    %2 = vector.load %arg3[%c0_3, %c0_4] : memref<8x32xf32, #tpu.memory_space<vmem>>, vector<8x32xf32>
    %cst = arith.constant dense<0.000000e+00> : vector<2x32xf32>
    %3 = tpu.matmul %0, %2, %cst {dimension_numbers = #tpu.dot_dimension_numbers<[1], [0], [0], [1], [0, 0, 1, 1], [], []>} : vector<2x8xf32>, vector<8x32xf32>, vector<2x32xf32> -> vector<2x32xf32>
    %c0_5 = arith.constant 0 : index
    %c0_6 = arith.constant 0 : index
    %4 = vector.load %arg4[%c0_5, %c0_6] : memref<4x32xf32, #tpu.memory_space<vmem>>, vector<4x32xf32>
    %cst_7 = arith.constant dense<0.000000e+00> : vector<2x32xf32>
    %5 = tpu.matmul %1, %4, %cst_7 {dimension_numbers = #tpu.dot_dimension_numbers<[1], [0], [0], [1], [0, 0, 1, 1], [], []>} : vector<2x4xf32>, vector<4x32xf32>, vector<2x32xf32> -> vector<2x32xf32>
    %6 = arith.addf %3, %5 : vector<2x32xf32>
    %c0_8 = arith.constant 0 : index
    %c0_9 = arith.constant 0 : index
    %7 = vector.load %arg5[%c0_8, %c0_9] : memref<3x32xf32, #tpu.memory_space<vmem>>, vector<3x32xf32>
    %8 = vector.extract_strided_slice %7 {offsets = [0, 0], sizes = [1, 32], strides = [1, 1]} : vector<3x32xf32> to vector<1x32xf32>
    %9 = vector.broadcast %8 : vector<1x32xf32> to vector<2x32xf32>
    %10 = arith.addf %6, %9 : vector<2x32xf32>
    %cst_10 = arith.constant 0.000000e+00 : f32
    %11 = vector.broadcast %cst_10 : f32 to vector<2x32xf32>
    %12 = arith.maximumf %10, %11 : vector<2x32xf32>
    %13 = vector.extract_strided_slice %7 {offsets = [1, 0], sizes = [1, 32], strides = [1, 1]} : vector<3x32xf32> to vector<1x32xf32>
    %14 = vector.extract_strided_slice %7 {offsets = [2, 0], sizes = [1, 32], strides = [1, 1]} : vector<3x32xf32> to vector<1x32xf32>
    %cst_11 = arith.constant dense<0.000000e+00> : vector<2xf32>
    %15 = vector.multi_reduction <add>, %12, %cst_11 [1] : vector<2x32xf32> to vector<2xf32>
    %16 = vector.shape_cast %15 : vector<2xf32> to vector<2x1xf32>
    %cst_12 = arith.constant 3.200000e+01 : f32
    %17 = vector.broadcast %cst_12 : f32 to vector<2x1xf32>
    %18 = arith.divf %16, %17 : vector<2x1xf32>
    %19 = vector.broadcast %18 : vector<2x1xf32> to vector<2x32xf32>
    %20 = arith.subf %12, %19 : vector<2x32xf32>
    %21 = vector.broadcast %18 : vector<2x1xf32> to vector<2x32xf32>
    %22 = arith.subf %12, %21 : vector<2x32xf32>
    %23 = arith.mulf %20, %22 : vector<2x32xf32>
    %cst_13 = arith.constant dense<0.000000e+00> : vector<2xf32>
    %24 = vector.multi_reduction <add>, %23, %cst_13 [1] : vector<2x32xf32> to vector<2xf32>
    %25 = vector.shape_cast %24 : vector<2xf32> to vector<2x1xf32>
    %cst_14 = arith.constant 3.200000e+01 : f32
    %26 = vector.broadcast %cst_14 : f32 to vector<2x1xf32>
    %27 = arith.divf %25, %26 : vector<2x1xf32>
    %28 = vector.broadcast %18 : vector<2x1xf32> to vector<2x32xf32>
    %29 = arith.subf %12, %28 : vector<2x32xf32>
    %cst_15 = arith.constant 9.99999974E-6 : f32
    %30 = vector.broadcast %cst_15 : f32 to vector<2x1xf32>
    %31 = arith.addf %27, %30 : vector<2x1xf32>
    %32 = math.rsqrt %31 : vector<2x1xf32>
    %33 = vector.broadcast %32 : vector<2x1xf32> to vector<2x32xf32>
    %34 = arith.mulf %29, %33 : vector<2x32xf32>
    %35 = vector.broadcast %13 : vector<1x32xf32> to vector<2x32xf32>
    %36 = arith.mulf %34, %35 : vector<2x32xf32>
    %37 = vector.broadcast %14 : vector<1x32xf32> to vector<2x32xf32>
    %38 = arith.addf %36, %37 : vector<2x32xf32>
    %c0_16 = arith.constant 0 : index
    %c0_17 = arith.constant 0 : index
    %39 = vector.load %arg6[%c0_16, %c0_17] : memref<32x32xf32, #tpu.memory_space<vmem>>, vector<32x32xf32>
    %cst_18 = arith.constant dense<0.000000e+00> : vector<2x32xf32>
    %40 = tpu.matmul %38, %39, %cst_18 {dimension_numbers = #tpu.dot_dimension_numbers<[1], [0], [0], [1], [0, 0, 1, 1], [], []>} : vector<2x32xf32>, vector<32x32xf32>, vector<2x32xf32> -> vector<2x32xf32>
    %c0_19 = arith.constant 0 : index
    %c0_20 = arith.constant 0 : index
    %41 = vector.load %arg7[%c0_19, %c0_20] : memref<3x32xf32, #tpu.memory_space<vmem>>, vector<3x32xf32>
    %42 = vector.extract_strided_slice %41 {offsets = [0, 0], sizes = [1, 32], strides = [1, 1]} : vector<3x32xf32> to vector<1x32xf32>
    %43 = vector.broadcast %42 : vector<1x32xf32> to vector<2x32xf32>
    %44 = arith.addf %40, %43 : vector<2x32xf32>
    %cst_21 = arith.constant 0.000000e+00 : f32
    %45 = vector.broadcast %cst_21 : f32 to vector<2x32xf32>
    %46 = arith.maximumf %44, %45 : vector<2x32xf32>
    %47 = vector.extract_strided_slice %41 {offsets = [1, 0], sizes = [1, 32], strides = [1, 1]} : vector<3x32xf32> to vector<1x32xf32>
    %48 = vector.extract_strided_slice %41 {offsets = [2, 0], sizes = [1, 32], strides = [1, 1]} : vector<3x32xf32> to vector<1x32xf32>
    %cst_22 = arith.constant dense<0.000000e+00> : vector<2xf32>
    %49 = vector.multi_reduction <add>, %46, %cst_22 [1] : vector<2x32xf32> to vector<2xf32>
    %50 = vector.shape_cast %49 : vector<2xf32> to vector<2x1xf32>
    %cst_23 = arith.constant 3.200000e+01 : f32
    %51 = vector.broadcast %cst_23 : f32 to vector<2x1xf32>
    %52 = arith.divf %50, %51 : vector<2x1xf32>
    %53 = vector.broadcast %52 : vector<2x1xf32> to vector<2x32xf32>
    %54 = arith.subf %46, %53 : vector<2x32xf32>
    %55 = vector.broadcast %52 : vector<2x1xf32> to vector<2x32xf32>
    %56 = arith.subf %46, %55 : vector<2x32xf32>
    %57 = arith.mulf %54, %56 : vector<2x32xf32>
    %cst_24 = arith.constant dense<0.000000e+00> : vector<2xf32>
    %58 = vector.multi_reduction <add>, %57, %cst_24 [1] : vector<2x32xf32> to vector<2xf32>
    %59 = vector.shape_cast %58 : vector<2xf32> to vector<2x1xf32>
    %cst_25 = arith.constant 3.200000e+01 : f32
    %60 = vector.broadcast %cst_25 : f32 to vector<2x1xf32>
    %61 = arith.divf %59, %60 : vector<2x1xf32>
    %62 = vector.broadcast %52 : vector<2x1xf32> to vector<2x32xf32>
    %63 = arith.subf %46, %62 : vector<2x32xf32>
    %cst_26 = arith.constant 9.99999974E-6 : f32
    %64 = vector.broadcast %cst_26 : f32 to vector<2x1xf32>
    %65 = arith.addf %61, %64 : vector<2x1xf32>
    %66 = math.rsqrt %65 : vector<2x1xf32>
    %67 = vector.broadcast %66 : vector<2x1xf32> to vector<2x32xf32>
    %68 = arith.mulf %63, %67 : vector<2x32xf32>
    %69 = vector.broadcast %47 : vector<1x32xf32> to vector<2x32xf32>
    %70 = arith.mulf %68, %69 : vector<2x32xf32>
    %71 = vector.broadcast %48 : vector<1x32xf32> to vector<2x32xf32>
    %72 = arith.addf %70, %71 : vector<2x32xf32>
    %c0_27 = arith.constant 0 : index
    %c0_28 = arith.constant 0 : index
    %73 = vector.load %arg8[%c0_27, %c0_28] : memref<2x32xf32, #tpu.memory_space<vmem>>, vector<2x32xf32>
    %74 = vector.extract_strided_slice %73 {offsets = [0, 0], sizes = [1, 32], strides = [1, 1]} : vector<2x32xf32> to vector<1x32xf32>
    %75 = vector.broadcast %74 : vector<1x32xf32> to vector<2x32xf32>
    %76 = arith.mulf %72, %75 : vector<2x32xf32>
    %cst_29 = arith.constant dense<0.000000e+00> : vector<2xf32>
    %77 = vector.multi_reduction <add>, %76, %cst_29 [1] : vector<2x32xf32> to vector<2xf32>
    %78 = vector.shape_cast %77 : vector<2xf32> to vector<2x1xf32>
    %79 = vector.extract_strided_slice %73 {offsets = [1, 0], sizes = [1, 1], strides = [1, 1]} : vector<2x32xf32> to vector<1x1xf32>
    %80 = vector.broadcast %79 : vector<1x1xf32> to vector<2x1xf32>
    %81 = arith.addf %78, %80 : vector<2x1xf32>
    %82 = vector.shape_cast %81 : vector<2x1xf32> to vector<2x1xf32>
    %83 = vector.broadcast %82 : vector<2x1xf32> to vector<2x128xf32>
    %c0_30 = arith.constant 0 : index
    %c0_31 = arith.constant 0 : index
    %84 = vector.load %arg9[%c0_30, %c0_31] : memref<2x128xf32, #tpu.memory_space<vmem>>, vector<2x128xf32>
    tpu.vector_store %arg9[%c0_30, %c0_31], %83 {strides = array<i32>} : memref<2x128xf32, #tpu.memory_space<vmem>>, vector<2x128xf32>,
    return
  }
  func.func @transform_0(%arg0: i32) -> (i32, i32) {
    %c0_i32 = arith.constant 0 : i32
    %c0_i32_0 = arith.constant 0 : i32
    return %arg0, %c0_i32 : i32, i32
  }
  func.func @transform_1(%arg0: i32) -> (i32, i32) {
    %c0_i32 = arith.constant 0 : i32
    %c0_i32_0 = arith.constant 0 : i32
    return %arg0, %c0_i32 : i32, i32
  }
  func.func @transform_2(%arg0: i32) -> (i32, i32) {
    %c0_i32 = arith.constant 0 : i32
    %c0_i32_0 = arith.constant 0 : i32
    %c0_i32_1 = arith.constant 0 : i32
    return %c0_i32, %c0_i32_0 : i32, i32
  }
  func.func @transform_3(%arg0: i32) -> (i32, i32) {
    %c0_i32 = arith.constant 0 : i32
    %c0_i32_0 = arith.constant 0 : i32
    %c0_i32_1 = arith.constant 0 : i32
    return %c0_i32, %c0_i32_0 : i32, i32
  }
  func.func @transform_4(%arg0: i32) -> (i32, i32) {
    %c0_i32 = arith.constant 0 : i32
    %c0_i32_0 = arith.constant 0 : i32
    %c0_i32_1 = arith.constant 0 : i32
    return %c0_i32, %c0_i32_0 : i32, i32
  }
  func.func @transform_5(%arg0: i32) -> (i32, i32) {
    %c0_i32 = arith.constant 0 : i32
    %c0_i32_0 = arith.constant 0 : i32
    %c0_i32_1 = arith.constant 0 : i32
    return %c0_i32, %c0_i32_0 : i32, i32
  }
  func.func @transform_6(%arg0: i32) -> (i32, i32) {
    %c0_i32 = arith.constant 0 : i32
    %c0_i32_0 = arith.constant 0 : i32
    %c0_i32_1 = arith.constant 0 : i32
    return %c0_i32, %c0_i32_0 : i32, i32
  }
  func.func @transform_7(%arg0: i32) -> (i32, i32) {
    %c0_i32 = arith.constant 0 : i32
    %c0_i32_0 = arith.constant 0 : i32
    %c0_i32_1 = arith.constant 0 : i32
    return %c0_i32, %c0_i32_0 : i32, i32
  }
  func.func @transform_8(%arg0: i32) -> (i32, i32) {
    %c0_i32 = arith.constant 0 : i32
    %c0_i32_0 = arith.constant 0 : i32
    return %arg0, %c0_i32 : i32, i32
  }
}

</mosaic_0001>

<bundles_post_ra>
// kernel: critic_forward.1
= control target key start
LH: loop header
LB: loop body
LE: loop exit
PB: predicated region body
PF: predicated region fallthrough
CT: control target
= control target key end

     0   :  { %13 = vsyncpa [#allocation3], 0  ;;  %s734_s0 = inlined_call_operand.hbm [shape: f32[2,8], index: 0, kind: input, shape index: {}]   ;;  %s735_s1 = inlined_call_operand.vmem [shape: f32[2,4], index: 1, kind: input, shape index: {}]   ;;  %s736_s2 = inlined_call_operand.vmem [shape: f32[8,32], index: 2, kind: input, shape index: {}]   ;;  %s737_s3 = inlined_call_operand.vmem [shape: f32[4,32], index: 3, kind: input, shape index: {}]   ;;  %s738_s4 = inlined_call_operand.hbm [shape: f32[3,32], index: 4, kind: input, shape index: {}]   ;;  %s739_s5 = inlined_call_operand.hbm [shape: f32[32,32], index: 5, kind: input, shape index: {}]   ;;  %s740_s6 = inlined_call_operand.hbm [shape: f32[3,32], index: 6, kind: input, shape index: {}]   ;;  %s741_s7 = inlined_call_operand.hbm [shape: f32[2,32], index: 7, kind: input, shape index: {}]   ;;  %s742_s8 = inlined_call_operand.vmem [shape: f32[2,128], index: 8, kind: output, shape index: {}]  }
   0x1   :  { %14 = vsyncpa [#allocation5], 0 }
   0x2   :  { %15 = vsyncpa [#allocation8], 0  ;;  %s584_s27 = smov [#allocation4]   ;;  %s585_s29 = smov [#allocation7]  }
   0x3   :  { %s38_s28 = sshll.u32 %s584_s27, 4  ;;  %s60_s30 = sshll.u32 %s585_s29, 4  ;;  %s39_s28 = int_to_ptr.vmem [resolvable:$true] %s38_s28  ;;  %s61_s30 = int_to_ptr.vmem [resolvable:$true] %s60_s30 }
   0x4   :  { %s468_s11 = scalar_lea.hbm %s738_s4, 64 }
   0x5   :  { %p469_p0 = scmp.ne.s32.totalorder %s738_s4, %s468_s11  ;;  %p472_p1 = scmp.lt.u32.totalorder %s468_s11, %s738_s4 }
   0x7   :  { %p474_p2 = pnand %p472_p1, %p469_p0 }
   0x9   :  { %477 = shalt.err (!%p474_p2)
}
   0xa   :  { %s478_s16 = scalar_lea.vmem %s39_s28, 64  ;;  %p483_p4 = scmp.lt.s32.totalorder %s39_s28, %s39_s28 }
   0xb   :  { %p479_p3 = scmp.ne.s32.totalorder %s39_s28, %s478_s16  ;;  %p484_p5 = scmp.lt.s32.totalorder %s478_s16, %s478_s16 }
   0xd   :  { %p485_p6 = por %p484_p5, %p483_p4 }
   0xf   :  { %p486_p7 = pnand %p485_p6, %p479_p3 }
  0x11   :  { %489 = shalt.err (!%p486_p7)
}
  0x12   :  { %41 = dma.hbm_to_vmem [thread:$0]  %s738_s4, 64, %s39_s28, [#allocation5]  }
  0x13   :  { %s490_s21 = scalar_lea.hbm %s740_s6, 64 }
  0x14   :  { %p491_p8 = scmp.ne.s32.totalorder %s740_s6, %s490_s21  ;;  %p494_p9 = scmp.lt.u32.totalorder %s490_s21, %s740_s6 }
  0x16   :  { %p496_p10 = pnand %p494_p9, %p491_p8 }
  0x18   :  { %499 = shalt.err (!%p496_p10)
}
  0x19   :  { %s500_s26 = scalar_lea.vmem %s61_s30, 64  ;;  %p505_p12 = scmp.lt.s32.totalorder %s61_s30, %s61_s30 }
  0x1a   :  { %p501_p11 = scmp.ne.s32.totalorder %s61_s30, %s500_s26  ;;  %p506_p13 = scmp.lt.s32.totalorder %s500_s26, %s500_s26 }
  0x1c   :  { %p507_p0 = por %p506_p13, %p505_p12 }
  0x1e   :  { %p508_p1 = pnand %p507_p0, %p501_p11 }
  0x20   :  { %511 = shalt.err (!%p508_p1)
}
  0x21   :  { %63 = dma.hbm_to_vmem [thread:$0]  %s740_s6, 64, %s61_s30, [#allocation8]  }
  0x22   :  { %s586_s28 = smov [#allocation2]   ;;  %s587_s9 = smov [#allocation6]  }
  0x23   :  { %s22_s29 = sshll.u32 %s586_s28, 4  ;;  %s47_s10 = sshll.u32 %s587_s9, 4  ;;  %s23_s29 = int_to_ptr.vmem [resolvable:$true] %s22_s29  ;;  %s664_s10 = int_to_ptr.vmem [resolvable:$true] %s47_s10 }
  0x24   :  { %s512_s13 = scalar_lea.hbm %s734_s0, 32 }
  0x25   :  { %p513_p2 = scmp.ne.s32.totalorder %s734_s0, %s512_s13  ;;  %p516_p3 = scmp.lt.u32.totalorder %s512_s13, %s734_s0 }
  0x27   :  { %p518_p4 = pnand %p516_p3, %p513_p2 }
  0x29   :  { %521 = shalt.err (!%p518_p4)
}
  0x2a   :  { %s522_s6 = scalar_lea.vmem %s23_s29, 32  ;;  %p527_p6 = scmp.lt.s32.totalorder %s23_s29, %s23_s29 }
  0x2b   :  { %p523_p5 = scmp.ne.s32.totalorder %s23_s29, %s522_s6  ;;  %p528_p7 = scmp.lt.s32.totalorder %s522_s6, %s522_s6 }
  0x2d   :  { %p529_p8 = por %p528_p7, %p527_p6 }
  0x2f   :  { %p530_p9 = pnand %p529_p8, %p523_p5 }
  0x31   :  { %533 = shalt.err (!%p530_p9)
}
  0x32   :  { %25 = dma.hbm_to_vmem [thread:$0]  %s734_s0, 32, %s23_s29, [#allocation3]  }
  0x33   :  { %s534_s21 = scalar_lea.hbm %s739_s5, 512 }
  0x34   :  { %p535_p10 = scmp.ne.s32.totalorder %s739_s5, %s534_s21  ;;  %p538_p11 = scmp.lt.u32.totalorder %s534_s21, %s739_s5 }
  0x36   :  { %p540_p12 = pnand %p538_p11, %p535_p10 }
  0x38   :  { %543 = shalt.err (!%p540_p12)
}
  0x39   :  { %s544_s26 = scalar_lea.vmem %s664_s10, 512  ;;  %p549_p0 = scmp.lt.s32.totalorder %s664_s10, %s664_s10 }
  0x3a   :  { %p545_p13 = scmp.ne.s32.totalorder %s664_s10, %s544_s26  ;;  %p550_p1 = scmp.lt.s32.totalorder %s544_s26, %s544_s26 }
  0x3c   :  { %p551_p2 = por %p550_p1, %p549_p0 }
  0x3e   :  { %p552_p3 = pnand %p551_p2, %p545_p13 }
  0x40   :  { %555 = shalt.err (!%p552_p3)
}
  0x41   :  { %s588_s0 = smov 128   ;;  %s589_s4 = smov 8  }
  0x42   :  { %53 = dma.hbm_to_vmem [thread:$0]  %s739_s5, 512, %s664_s10, [#allocation5], %s588_s0, %s588_s0, %s589_s4  }
  0x43   :  { %s590_s29 = smov [#allocation9]   ;;  %s556_s13 = scalar_lea.hbm %s741_s7, 32 }
  0x44   :  { %s70_s9 = sshll.u32 %s590_s29, 4  ;;  %p557_p4 = scmp.ne.s32.totalorder %s741_s7, %s556_s13  ;;  %s71_s9 = int_to_ptr.vmem [resolvable:$true] %s70_s9 }
  0x45   :  { %p560_p5 = scmp.lt.u32.totalorder %s556_s13, %s741_s7 }
  0x47   :  { %p562_p6 = pnand %p560_p5, %p557_p4 }
  0x49   :  { %565 = shalt.err (!%p562_p6)
}
  0x4a   :  { %s566_s6 = scalar_lea.vmem %s71_s9, 32  ;;  %p571_p8 = scmp.lt.s32.totalorder %s71_s9, %s71_s9 }
  0x4b   :  { %p567_p7 = scmp.ne.s32.totalorder %s71_s9, %s566_s6  ;;  %p572_p9 = scmp.lt.s32.totalorder %s566_s6, %s566_s6 }
  0x4d   :  { %p573_p10 = por %p572_p9, %p571_p8 }
  0x4f   :  { %p574_p11 = pnand %p573_p10, %p567_p7 }
  0x51   :  { %577 = shalt.err (!%p574_p11)
}
  0x52   :  { %73 = dma.hbm_to_vmem [thread:$0]  %s741_s7, 32, %s71_s9, [#allocation8]  }
  0x53   :  { %578 = dma.done.wait [#allocation3], 32  }
  0x54   :  { %579 = vsyncadd [#allocation3], 4294967264 }
  0x55   :  { %580 = dma.done.wait [#allocation5], 576  }
  0x56   :  { %581 = vsyncadd [#allocation5], 4294966720 }
  0x57   :  { %582 = dma.done.wait [#allocation8], 96  }
  0x58   :  { %583 = vsyncadd [#allocation8], 4294967200  ;;  %v591_v0 = vmov 0.0   ;;  %vm592_vm0 = vmmov 0   ;;  %vm97_vm1 = vcmask 1043456   ;;  %vm93_vm2 = vcmask 31744  }
  0x59   :  { %424 = vmatprep.subr.mxu1 %v591_v0  ;;  %426 = vmatprep.mubr.msk.f32.mxu1 %vm592_vm0, %v591_v0  ;;  %v92_v1 = vld [vmem:[%s737_s3] sm:$0xf]  ;;  %v89_v4 = vld [vmem:[#allocation2] sm:$0x3]  ;;  %vm171_vm3 = vcmask 64512   ;;  %v246_v5 = vlaneseq  ;;  %vm252_vm4 = vcmask 254976  }
  0x5a   :  { %442 = vmatprep.mubr.msk.f32.mxu0 %vm592_vm0, %v591_v0  ;;  %v90_v2 = vld [vmem:[%s735_s1] sm:$0x3]  ;;  %425 = vmatpush3.msk.msra.mxu1 %vm97_vm1, %v92_v1  ;;  %v245_v9 = vld [vmem:[#allocation4] sm:$0x7]  ;;  %v277_v23 = vld [vmem:[#allocation6] sm:$0xff]  ;;  %v593_v26 = vmov 0.0|0.0  }
  0x5b   :  { %v91_v3 = vld [vmem:[%s736_s2] sm:$0xff]  ;;  %427 = vmatmul.mubr.msk.f32.vlgmr.msra.gmra.mrb[0].mxu1 %vm93_vm2, %v90_v2  ;;  %429 = vmatprep.subr.mxu1 %v591_v0  ;;  %v716_v6 = vshrl.u32 %v246_v5, 7  ;;  %v278_v24 = vld [vmem:[#allocation6 + $0x8] sm:$0xff]  ;;  %vm286_vm5 = vcmask 261120   ;;  %v281_v41 = vld [vmem:[#allocation7] sm:$0x7] }
  0x5c   :  { %430 = vmatpush3.msra.mxu1 %v91_v3  ;;  %431 = vmatprep.mubr.msk.f32.mxu1 %vm592_vm0, %v591_v0  ;;  %v279_v25 = vld [vmem:[#allocation6 + $0x10] sm:$0xff]  ;;  %v446_v27 = vpack.c.bf16 %v278_v24, %v277_v23  ;;  %v280_v28 = vld [vmem:[#allocation6 + $0x18] sm:$0xff]  ;;  %v384_v58 = vld [vmem:[#allocation9] sm:$0x3]  ;;  %v594_v2 = vmov 0  }
  0x5d   :  { %v719_v7 = vsub.s32 0, %v716_v6  ;;  %445 = vmatprep.subr.bf16.mxu0 %v593_v26  ;;  %v449_v29 = vpack.c.bf16 %v280_v28, %v279_v25  ;;  %v269_v33 = vsub.s32 1, %v716_v6  ;;  %v274_v34 = vsub.s32 2, %v716_v6  ;;  %462 = vset.pattern.permute.xlu1 %v594_v2 }
  0x5e   :  { %447 = vmatpush3.bf16.msra.mxu0 %v446_v27  ;;  %463 = vset.pattern.permute.xlu0 %v594_v2 }
  0x5f   :  { %432 = vmatmul.mubr.msk.f32.vlgmr.msra.gmra.mrb[2].mxu1 %vm171_vm3, %v89_v4  ;;  %v249_v11 = vrot.slane %v245_v9, %v719_v7  ;;  %448 = vmatprep.subr.bf16.mxu0 %v593_v26  ;;  %v270_v35 = vrot.slane %v245_v9, %v269_v33  ;;  %v275_v37 = vrot.slane %v245_v9, %v274_v34 }
  0x60   :  { %v285_v42 = vrot.slane %v281_v41, %v719_v7  ;;  %v377_v56 = vrot.slane %v281_v41, %v269_v33  ;;  %v382_v60 = vrot.slane %v281_v41, %v274_v34  ;;  %v388_v62 = vrot.slane %v384_v58, %v719_v7 }
  0x61   :  { %v396_v3 = vrot.slane %v384_v58, %v269_v33 }
  0x62   :  { %450 = vmatpush3.bf16.msra.mxu0 %v449_v29 }
 0x12e   :  { %v167_v8 = vpop.f32.mrb[0].mxu1 }
 0x12f   :  { %v428_v10 = vpop.f32.mrb[1].mxu1 }
 0x132   :  { %v241_v12 = vpop.f32.mrb[2].mxu1 }
 0x133   :  { %v242_v13 = vadd.f32 %v241_v12, %v167_v8  ;;  %v433_v14 = vpop.f32.mrb[3].mxu1 }
 0x135   :  { %v250_v15 = vadd.f32 %v249_v11, %v242_v13 }
 0x137   :  { %v251_v16 = vmax.f32 %v250_v15, 0.0 }
 0x139   :  { %v253_v17 = vsel %vm252_vm4, %v251_v16, 0.0 }
 0x13a   :  { %254 = vadd.xlane.f32.xlu0 %v253_v17 }
 0x1c7   :  { %v255_v18 = vpop.xlane.xlu0 %254 }
 0x1c8   :  { %v257_v19 = vmul.f32 0.03125, %v255_v18 }
 0x1ca   :  { %v258_v20 = vsub.f32 %v251_v16, %v257_v19 }
 0x1cc   :  { %v259_v21 = vmul.f32 %v258_v20, %v258_v20 }
 0x1ce   :  { %v260_v22 = vsel %vm252_vm4, %v259_v21, 0.0 }
 0x1cf   :  { %261 = vadd.xlane.f32.xlu0 %v260_v22 }
 0x25c   :  { %v262_v30 = vpop.xlane.xlu0 %261 }
 0x25d   :  { %v263_v31 = vmul.f32 0.03125, %v262_v30 }
 0x25f   :  { %v264_v32 = vadd.f32 1e-05, %v263_v31 }
 0x261   :  { %464 = vrsqrt.f32 %v264_v32 }
 0x26b   :  { %v465_v36 = vpop.eup %464 }
 0x26c   :  { %v266_v38 = vmul.f32 %v465_v36, %v258_v20 }
 0x26e   :  { %v271_v39 = vmul.f32 %v270_v35, %v266_v38 }
 0x270   :  { %v276_v40 = vadd.f32 %v275_v37, %v271_v39 }
 0x272   :  { %443 = vmatmul.mubr.msk.f32.vlgmr.msra.gmra.mrb[0].mxu0 %vm286_vm5, %v276_v40 }
 0x345   :  { %v356_v43 = vpop.f32.mrb[0].mxu0 }
 0x346   :  { %v357_v44 = vadd.f32 %v356_v43, %v285_v42  ;;  %v444_v45 = vpop.f32.mrb[1].mxu0 }
 0x348   :  { %v360_v46 = vmax.f32 %v357_v44, 0.0 }
 0x34a   :  { %v361_v47 = vsel %vm252_vm4, %v360_v46, 0.0 }
 0x34b   :  { %362 = vadd.xlane.f32.xlu1 %v361_v47 }
 0x3d8   :  { %v363_v48 = vpop.xlane.xlu1 %362 }
 0x3d9   :  { %v364_v49 = vmul.f32 0.03125, %v363_v48 }
 0x3db   :  { %v365_v50 = vsub.f32 %v360_v46, %v364_v49 }
 0x3dd   :  { %v366_v51 = vmul.f32 %v365_v50, %v365_v50 }
 0x3df   :  { %v367_v52 = vsel %vm252_vm4, %v366_v51, 0.0 }
 0x3e0   :  { %368 = vadd.xlane.f32.xlu1 %v367_v52 }
 0x46d   :  { %v369_v53 = vpop.xlane.xlu1 %368 }
 0x46e   :  { %v370_v54 = vmul.f32 0.03125, %v369_v53 }
 0x470   :  { %v371_v55 = vadd.f32 1e-05, %v370_v54 }
 0x472   :  { %466 = vrsqrt.f32 %v371_v55 }
 0x47c   :  { %v467_v57 = vpop.eup %466 }
 0x47d   :  { %v373_v59 = vmul.f32 %v467_v57, %v365_v50 }
 0x47f   :  { %v378_v61 = vmul.f32 %v377_v56, %v373_v59 }
 0x481   :  { %v383_v63 = vadd.f32 %v382_v60, %v378_v61 }
 0x483   :  { %v389_v0 = vmul.f32 %v388_v62, %v383_v63 }
 0x485   :  { %v390_v1 = vsel %vm252_vm4, %v389_v0, 0.0 }
 0x486   :  { %391 = vadd.xlane.f32.xlu0 %v390_v1 }
 0x513   :  { %v392_v4 = vpop.xlane.xlu0 %391 }
 0x514   :  { %v397_v5 = vadd.f32 %v396_v3, %v392_v4 }
 0x516   :  { %400 = vperm.xlu1 %462, %v397_v5  }
 0x595   :  { %v401_v6 = vpop.permute.xlu1 %400 }
 0x596   :  { %403 = vst [vmem:[%s742_s8] sm:$0x3] %v401_v6 }
 0x597   :  { %408 = vsyncpa [#allocation3], 1 }
 0x598   :  { %409 = vsyncpa [#allocation5], 1 }
 0x599   :  { %410 = vsyncpa [#allocation8], 1 }

</bundles_post_ra>
